<compile_context>
chip_gen: v7x
topology: tpu7x:2x2x1
jax: 0.10.0
libtpu: 0.0.40
codegen_flags: <defaults>
</compile_context>

<pallas_src>
import math

import jax
import jax.numpy as jnp
from jax.experimental import pallas as pl
from jax.experimental.pallas import tpu as pltpu


def _round_up(n, m):
    return ((n + m - 1) // m) * m


# ---------------------------------------------------------------------------
# Kernels
# ---------------------------------------------------------------------------
def _resident_kernel(x_ref, w1_ref, w2_ref, o_ref):
    # Both fused weight matrices are VMEM-resident; one batch tile per grid step.
    # (TM, D_in) @ (D_in, H) -> relu -> (TM, H) @ (H, D_out); f32 MXU accumulation.
    h = jnp.dot(x_ref[...], w1_ref[...], preferred_element_type=jnp.float32)
    h = jnp.maximum(h, 0.0)
    o_ref[...] = jnp.dot(
        h.astype(w2_ref.dtype), w2_ref[...], preferred_element_type=jnp.float32
    ).astype(o_ref.dtype)


def _htiled_kernel(x_ref, w1_ref, w2_ref, o_ref, acc_ref):
    # Hidden dim tiled as a reduction grid axis (axis 1); weights streamed.
    # Valid because relu is elementwise per hidden column and the second matmul
    # reduces over the hidden dim -> accumulate partial products in f32 scratch.
    k = pl.program_id(1)

    @pl.when(k == 0)
    def _():
        acc_ref[...] = jnp.zeros_like(acc_ref)

    h = jnp.dot(x_ref[...], w1_ref[...], preferred_element_type=jnp.float32)
    h = jnp.maximum(h, 0.0)
    acc_ref[...] += jnp.dot(
        h.astype(w2_ref.dtype), w2_ref[...], preferred_element_type=jnp.float32
    )

    @pl.when(k == pl.num_programs(1) - 1)
    def _():
        o_ref[...] = acc_ref[...].astype(o_ref.dtype)


# ---------------------------------------------------------------------------
# Weight preparation (do once, outside the per-step forward)
# ---------------------------------------------------------------------------
def prepare_params(input_mask, w1, w2a, w2b, compute_dtype=jnp.float32):
    """Fuse mask/Hadamard, transpose, and zero-pad to lane-dense shapes.

    input_mask: (1, D_in); w1: (H, D_in); w2a/w2b: (D_out, H).
    Returns:
      w1m_t: (D_in_pad, H_pad)      = (w1 * input_mask)^T, zero-padded
      w2_t : (H_pad,    D_out_pad)  = (w2a * w2b)^T,       zero-padded
      d_in, d_out: true (unpadded) dims.
    """
    H, d_in = w1.shape
    d_out = w2a.shape[0]
    d_in_pad = _round_up(d_in, 128)
    H_pad = _round_up(H, 128)
    d_out_pad = _round_up(d_out, 128)

    w1m = (w1 * input_mask).astype(compute_dtype)   # (H, D_in), mask folded in
    w2 = (w2a * w2b).astype(compute_dtype)          # (D_out, H), Hadamard fused

    w1m_t = jnp.zeros((d_in_pad, H_pad), compute_dtype).at[:d_in, :H].set(w1m.T)
    w2_t = jnp.zeros((H_pad, d_out_pad), compute_dtype).at[:H, :d_out].set(w2.T)
    return w1m_t, w2_t, d_in, d_out


def _vmem_budget_bytes():
    """Generation-aware VMEM budget (per TensorCore), with ~15% headroom."""
    try:
        phys = int(pltpu.get_tpu_info().vmem_capacity_bytes)
    except Exception:
        phys = 64 << 20  # conservative: v7x per-TensorCore VMEM
    return max(int(phys * 0.85), 16 << 20)


# ---------------------------------------------------------------------------
# Forward
# ---------------------------------------------------------------------------
def sparse_feature_net_forward(x, w1m_t, w2_t, d_in, d_out, *,
                               tm_cap=2048, force_weight_tiling=False,
                               th_cap=None):
    """x: (B, d_in) float32. Returns (out, out) with out: (B, d_out) float32."""
    B = x.shape[0]
    d_in_pad, H_pad = w1m_t.shape
    d_out_pad = w2_t.shape[1]
    compute_dtype = w1m_t.dtype
    itemsize = jnp.dtype(compute_dtype).itemsize
    out_itemsize = 4  # output stays f32

    sub = 8 if itemsize >= 4 else 16   # sublane multiple for the batch tile
    budget = _vmem_budget_bytes()

    # Per-row VMEM cost of the pipelined streams (x tile + out tile, 2 buffers).
    row_bytes = 2 * d_in_pad * itemsize + 2 * d_out_pad * out_itemsize
    # Resident weights are single-buffered (pl.Buffered(1), constant index map).
    weight_bytes_resident = (d_in_pad * H_pad + H_pad * d_out_pad) * itemsize

    use_resident = (not force_weight_tiling) and (
        weight_bytes_resident + sub * row_bytes <= budget
    )

    # Derive the batch tile (TM) from the VMEM budget instead of a fixed cap.
    TH = 128
    if use_resident:
        tm_budget = (budget - weight_bytes_resident) // row_bytes
    else:
        # Hidden-dim tile: double-buffered streamed weight slabs take
        # 2*(d_in_pad + d_out_pad)*TH*itemsize bytes; cap at half the budget.
        per_h_col = 2 * (d_in_pad + d_out_pad) * itemsize
        TH = max(128, ((budget // 2) // per_h_col) // 128 * 128)
        TH = min(TH, _round_up(H_pad, 128))
        if th_cap is not None:
            TH = max(128, min(TH, th_cap))
        weight_stream_bytes = per_h_col * TH
        acc_row = d_out_pad * 4  # f32 accumulator scratch
        tm_budget = (budget - weight_stream_bytes) // (row_bytes + acc_row)

    tm_budget = max(tm_budget, sub)
    TM_cap = max(sub, min(tm_cap, (tm_budget // sub) * sub))

    B_sub = _round_up(B, sub)
    TM_cap = min(TM_cap, B_sub)
    n_tiles = pl.cdiv(B_sub, TM_cap)
    # At least 2 batch tiles when B is large so the "parallel" axis can be
    # sharded over v7x's two TensorCores (harmless on 1-TC chips).
    if B_sub >= 2 * sub:
        n_tiles = max(n_tiles, 2)
    TM = _round_up(pl.cdiv(B_sub, n_tiles), sub)
    B_pad = n_tiles * TM   # padding kept small (< n_tiles * sublane)

    # Pad x once: extra rows/cols are zeros -> contribute exactly 0 (sliced away).
    xc = x.astype(compute_dtype)
    pad_b, pad_d = B_pad - B, d_in_pad - d_in
    if pad_b or pad_d:
        xc = jnp.pad(xc, ((0, pad_b), (0, pad_d)))

    flops = 2 * B_pad * (d_in_pad * H_pad + H_pad * d_out_pad)
    bytes_accessed = (B_pad * d_in_pad * itemsize
                      + (d_in_pad * H_pad + H_pad * d_out_pad) * itemsize
                      + B_pad * d_out_pad * out_itemsize)
    cost = pl.CostEstimate(flops=flops, transcendentals=0,
                           bytes_accessed=bytes_accessed)

    if use_resident:
        def _resident_call(single_buffer_weights):
            pm = ({"pipeline_mode": pl.Buffered(1)}
                  if single_buffer_weights else {})
            return pl.pallas_call(
                _resident_kernel,
                out_shape=jax.ShapeDtypeStruct((B_pad, d_out_pad), jnp.float32),
                grid=(B_pad // TM,),
                in_specs=[
                    pl.BlockSpec((TM, d_in_pad), lambda i: (i, 0)),       # x (pipelined)
                    pl.BlockSpec((d_in_pad, H_pad), lambda i: (0, 0), **pm),   # W1 resident
                    pl.BlockSpec((H_pad, d_out_pad), lambda i: (0, 0), **pm),  # W2 resident
                ],
                out_specs=pl.BlockSpec((TM, d_out_pad), lambda i: (i, 0)),
                compiler_params=pltpu.CompilerParams(
                    dimension_semantics=("parallel",),
                    vmem_limit_bytes=budget,
                ),
                cost_estimate=cost,
            )(xc, w1m_t, w2_t)

        try:
            out = _resident_call(True)
        except Exception:
            # Fallback: default double-buffered weight blocks (always valid).
            out = _resident_call(False)
    else:
        # Hidden-dim-tiled fallback: pad H to a multiple of TH (extra zero
        # columns/rows contribute exactly 0: relu(0)=0 and 0 * w2 = 0).
        H_tiles = pl.cdiv(H_pad, TH)
        H_grid = H_tiles * TH
        w1s, w2s = w1m_t, w2_t
        if H_grid != H_pad:
            w1s = jnp.pad(w1s, ((0, 0), (0, H_grid - H_pad)))
            w2s = jnp.pad(w2s, ((0, H_grid - H_pad), (0, 0)))

        out = pl.pallas_call(
            _htiled_kernel,
            out_shape=jax.ShapeDtypeStruct((B_pad, d_out_pad), jnp.float32),
            grid=(B_pad // TM, H_tiles),
            in_specs=[
                pl.BlockSpec((TM, d_in_pad), lambda i, k: (i, 0)),   # x tile
                pl.BlockSpec((d_in_pad, TH), lambda i, k: (0, k)),   # W1 slab (streamed)
                pl.BlockSpec((TH, d_out_pad), lambda i, k: (k, 0)),  # W2 slab (streamed)
            ],
            out_specs=pl.BlockSpec((TM, d_out_pad), lambda i, k: (i, 0)),
            scratch_shapes=[pltpu.VMEM((TM, d_out_pad), jnp.float32)],
            compiler_params=pltpu.CompilerParams(
                dimension_semantics=("parallel", "arbitrary"),
                vmem_limit_bytes=budget,
            ),
            cost_estimate=cost,
        )(xc, w1s, w2s)

    out = out[:B, :d_out]
    return (out, out)


def sparse_feature_net(x, input_mask, w1, w2a, w2b, compute_dtype=jnp.float32,
                       **kwargs):
    """Convenience wrapper: weight prep + forward. In a real training/inference
    loop, hoist prepare_params() out of the per-step call."""
    w1m_t, w2_t, d_in, d_out = prepare_params(input_mask, w1, w2a, w2b,
                                              compute_dtype)
    return sparse_feature_net_forward(x, w1m_t, w2_t, d_in, d_out, **kwargs)


def init_params(key, input_dim, hidden_dim, output_dim):
    """Deterministic synthetic init mirroring the module's parameter shapes."""
    k_mask, k_w1, k_w2a, k_w2b = jax.random.split(key, 4)
    # SparseFeatureLinearRegression: input_mask ~ N(0, 1), shape (1, input_dim)
    input_mask = jax.random.normal(k_mask, (1, input_dim), dtype=jnp.float32)
    # nn.Linear(input_dim, hidden_dim, bias=False): kaiming-uniform-like
    b1 = 1.0 / math.sqrt(input_dim)
    w1 = jax.random.uniform(k_w1, (hidden_dim, input_dim), jnp.float32, -b1, b1)
    # SpaRedLinear(hidden_dim, output_dim, bias=False): two weights
    b2 = 1.0 / math.sqrt(hidden_dim)
    w2a = jax.random.uniform(k_w2a, (output_dim, hidden_dim), jnp.float32, -b2, b2)
    w2b = jax.random.uniform(k_w2b, (output_dim, hidden_dim), jnp.float32, -b2, b2)
    return input_mask, w1, w2a, w2b


if __name__ == "__main__":
    # Module default hidden_dim=200; small batch / feature dims.
    B, input_dim, hidden_dim, output_dim = 8, 16, 200, 8

    key = jax.random.PRNGKey(0)
    k_x, k_p = jax.random.split(key)
    x = jax.random.normal(k_x, (B, input_dim), dtype=jnp.float32)
    input_mask, w1, w2a, w2b = init_params(k_p, input_dim, hidden_dim, output_dim)

    # Pure-JAX reference.
    h_ref = jnp.maximum((x * input_mask) @ w1.T, 0.0)
    ref = h_ref @ (w2a * w2b).T

    # 1) f32, VMEM-resident-weights path (exact match expected).
    w1m_t, w2_t, d_in, d_out = prepare_params(input_mask, w1, w2a, w2b, jnp.float32)
    out1, out2 = sparse_feature_net_forward(x, w1m_t, w2_t, d_in, d_out)
    jax.block_until_ready(out1)
    assert out1.shape == (B, output_dim)
    assert jnp.allclose(out1, ref, atol=1e-4, rtol=1e-4)
    assert jnp.allclose(out2, ref, atol=1e-4, rtol=1e-4)

    # 2) f32, hidden-dim-tiled fallback (used when fused weights exceed the
    #    per-core VMEM budget, e.g. large models on v7x) — forced here.
    out_t, _ = sparse_feature_net_forward(
        x, w1m_t, w2_t, d_in, d_out, force_weight_tiling=True, th_cap=128)
    jax.block_until_ready(out_t)
    assert jnp.allclose(out_t, ref, atol=1e-4, rtol=1e-4)

    # 3) bf16 compute / f32 accumulate path (full-rate MXU dtype), loose tol.
    out_bf, _ = sparse_feature_net(x, input_mask, w1, w2a, w2b, jnp.bfloat16)
    jax.block_until_ready(out_bf)
    assert out_bf.shape == (B, output_dim)
    assert jnp.allclose(out_bf, ref, atol=1e-1, rtol=1e-1)

    print("KERNEL_OK")
</pallas_src>

<mosaic_0001>
module attributes {stable_mosaic.version = 11 : i64} {
  func.func @_resident_kernel(%arg0: i32, %arg1: memref<8x128xf32, #tpu.memory_space<vmem>>, %arg2: memref<128x256xf32, #tpu.memory_space<vmem>>, %arg3: memref<256x128xf32, #tpu.memory_space<vmem>>, %arg4: memref<8x128xf32, #tpu.memory_space<vmem>>) attributes {dimension_semantics = [#tpu.dimension_semantics<parallel>], iteration_bounds = array<i64: 1>, scalar_prefetch = 0 : i64, scratch_operands = 0 : i64, tpu.core_type = #tpu.core_type<tc>, window_params = [{transform_indices = @transform_0, window_bounds = array<i64: 8, 128>}, {pipeline_mode = #tpu.pipeline_mode<synchronous>, transform_indices = @transform_1, window_bounds = array<i64: 128, 256>}, {pipeline_mode = #tpu.pipeline_mode<synchronous>, transform_indices = @transform_2, window_bounds = array<i64: 256, 128>}, {transform_indices = @transform_3, window_bounds = array<i64: 8, 128>}]} {
    %c0 = arith.constant 0 : index
    %c0_0 = arith.constant 0 : index
    %0 = vector.load %arg1[%c0, %c0_0] : memref<8x128xf32, #tpu.memory_space<vmem>>, vector<8x128xf32>
    %c0_1 = arith.constant 0 : index
    %c0_2 = arith.constant 0 : index
    %1 = vector.load %arg2[%c0_1, %c0_2] : memref<128x256xf32, #tpu.memory_space<vmem>>, vector<128x256xf32>
    %cst = arith.constant dense<0.000000e+00> : vector<8x256xf32>
    %2 = tpu.matmul %0, %1, %cst {dimension_numbers = #tpu.dot_dimension_numbers<[1], [0], [0], [1], [0, 0, 1, 1], [], []>} : vector<8x128xf32>, vector<128x256xf32>, vector<8x256xf32> -> vector<8x256xf32>
    %cst_3 = arith.constant 0.000000e+00 : f32
    %3 = vector.broadcast %cst_3 : f32 to vector<8x256xf32>
    %4 = arith.maximumf %2, %3 : vector<8x256xf32>
    %c0_4 = arith.constant 0 : index
    %c0_5 = arith.constant 0 : index
    %5 = vector.load %arg3[%c0_4, %c0_5] : memref<256x128xf32, #tpu.memory_space<vmem>>, vector<256x128xf32>
    %cst_6 = arith.constant dense<0.000000e+00> : vector<8x128xf32>
    %6 = tpu.matmul %4, %5, %cst_6 {dimension_numbers = #tpu.dot_dimension_numbers<[1], [0], [0], [1], [0, 0, 1, 1], [], []>} : vector<8x256xf32>, vector<256x128xf32>, vector<8x128xf32> -> vector<8x128xf32>
    %c0_7 = arith.constant 0 : index
    %c0_8 = arith.constant 0 : index
    %7 = vector.load %arg4[%c0_7, %c0_8] : memref<8x128xf32, #tpu.memory_space<vmem>>, vector<8x128xf32>
    tpu.vector_store %arg4[%c0_7, %c0_8], %6 {strides = array<i32>} : memref<8x128xf32, #tpu.memory_space<vmem>>, vector<8x128xf32>,
    return
  }
  func.func @transform_0(%arg0: i32) -> (i32, i32) {
    %c0_i32 = arith.constant 0 : i32
    %c0_i32_0 = arith.constant 0 : i32
    return %arg0, %c0_i32 : i32, i32
  }
  func.func @transform_1(%arg0: i32) -> (i32, i32) {
    %c0_i32 = arith.constant 0 : i32
    %c0_i32_0 = arith.constant 0 : i32
    %c0_i32_1 = arith.constant 0 : i32
    return %c0_i32, %c0_i32_0 : i32, i32
  }
  func.func @transform_2(%arg0: i32) -> (i32, i32) {
    %c0_i32 = arith.constant 0 : i32
    %c0_i32_0 = arith.constant 0 : i32
    %c0_i32_1 = arith.constant 0 : i32
    return %c0_i32, %c0_i32_0 : i32, i32
  }
  func.func @transform_3(%arg0: i32) -> (i32, i32) {
    %c0_i32 = arith.constant 0 : i32
    %c0_i32_0 = arith.constant 0 : i32
    return %arg0, %c0_i32 : i32, i32
  }
}

module attributes {stable_mosaic.version = 11 : i64} {
  func.func @_resident_kernel(%arg0: i32, %arg1: memref<8x128xf32, #tpu.memory_space<vmem>>, %arg2: memref<128x256xf32, #tpu.memory_space<vmem>>, %arg3: memref<256x128xf32, #tpu.memory_space<vmem>>, %arg4: memref<8x128xf32, #tpu.memory_space<vmem>>) attributes {dimension_semantics = [#tpu.dimension_semantics<parallel>], iteration_bounds = array<i64: 1>, scalar_prefetch = 0 : i64, scratch_operands = 0 : i64, tpu.core_type = #tpu.core_type<tc>, window_params = [{transform_indices = @transform_0, window_bounds = array<i64: 8, 128>}, {pipeline_mode = #tpu.pipeline_mode<synchronous>, transform_indices = @transform_1, window_bounds = array<i64: 128, 256>}, {pipeline_mode = #tpu.pipeline_mode<synchronous>, transform_indices = @transform_2, window_bounds = array<i64: 256, 128>}, {transform_indices = @transform_3, window_bounds = array<i64: 8, 128>}]} {
    %c0 = arith.constant 0 : index
    %c0_0 = arith.constant 0 : index
    %0 = vector.load %arg1[%c0, %c0_0] : memref<8x128xf32, #tpu.memory_space<vmem>>, vector<8x128xf32>
    %c0_1 = arith.constant 0 : index
    %c0_2 = arith.constant 0 : index
    %1 = vector.load %arg2[%c0_1, %c0_2] : memref<128x256xf32, #tpu.memory_space<vmem>>, vector<128x256xf32>
    %cst = arith.constant dense<0.000000e+00> : vector<8x256xf32>
    %2 = tpu.matmul %0, %1, %cst {dimension_numbers = #tpu.dot_dimension_numbers<[1], [0], [0], [1], [0, 0, 1, 1], [], []>} : vector<8x128xf32>, vector<128x256xf32>, vector<8x256xf32> -> vector<8x256xf32>
    %cst_3 = arith.constant 0.000000e+00 : f32
    %3 = vector.broadcast %cst_3 : f32 to vector<8x256xf32>
    %4 = arith.maximumf %2, %3 : vector<8x256xf32>
    %c0_4 = arith.constant 0 : index
    %c0_5 = arith.constant 0 : index
    %5 = vector.load %arg3[%c0_4, %c0_5] : memref<256x128xf32, #tpu.memory_space<vmem>>, vector<256x128xf32>
    %cst_6 = arith.constant dense<0.000000e+00> : vector<8x128xf32>
    %6 = tpu.matmul %4, %5, %cst_6 {dimension_numbers = #tpu.dot_dimension_numbers<[1], [0], [0], [1], [0, 0, 1, 1], [], []>} : vector<8x256xf32>, vector<256x128xf32>, vector<8x128xf32> -> vector<8x128xf32>
    %c0_7 = arith.constant 0 : index
    %c0_8 = arith.constant 0 : index
    %7 = vector.load %arg4[%c0_7, %c0_8] : memref<8x128xf32, #tpu.memory_space<vmem>>, vector<8x128xf32>
    tpu.vector_store %arg4[%c0_7, %c0_8], %6 {strides = array<i32>} : memref<8x128xf32, #tpu.memory_space<vmem>>, vector<8x128xf32>,
    return
  }
  func.func @transform_0(%arg0: i32) -> (i32, i32) {
    %c0_i32 = arith.constant 0 : i32
    %c0_i32_0 = arith.constant 0 : i32
    return %arg0, %c0_i32 : i32, i32
  }
  func.func @transform_1(%arg0: i32) -> (i32, i32) {
    %c0_i32 = arith.constant 0 : i32
    %c0_i32_0 = arith.constant 0 : i32
    %c0_i32_1 = arith.constant 0 : i32
    return %c0_i32, %c0_i32_0 : i32, i32
  }
  func.func @transform_2(%arg0: i32) -> (i32, i32) {
    %c0_i32 = arith.constant 0 : i32
    %c0_i32_0 = arith.constant 0 : i32
    %c0_i32_1 = arith.constant 0 : i32
    return %c0_i32, %c0_i32_0 : i32, i32
  }
  func.func @transform_3(%arg0: i32) -> (i32, i32) {
    %c0_i32 = arith.constant 0 : i32
    %c0_i32_0 = arith.constant 0 : i32
    return %arg0, %c0_i32 : i32, i32
  }
}

</mosaic_0001>

<bundles_post_ra>
// kernel: tpu_custom_call.1
= control target key start
LH: loop header
LB: loop body
LE: loop exit
PB: predicated region body
PF: predicated region fallthrough
CT: control target
= control target key end

     0   :  { %8 = vsyncpa [#allocation3], 0  ;;  %s558_s0 = inlined_call_operand.hbm [shape: f32[8,128], index: 0, kind: input, shape index: {}]   ;;  %s559_s1 = inlined_call_operand.hbm [shape: f32[128,256], index: 1, kind: input, shape index: {}]   ;;  %s560_s2 = inlined_call_operand.hbm [shape: f32[256,128], index: 2, kind: input, shape index: {}]   ;;  %s561_s3 = inlined_call_operand.hbm [shape: f32[8,128], index: 3, kind: output, shape index: {}]  }
   0x1   :  { %9 = vsyncpa [#allocation6], 0 }
   0x2   :  { %10 = vsyncpa [#allocation4], 0  ;;  %s481_s12 = smov [#allocation5]   ;;  %s387_s16 = scalar_lea.hbm %s559_s1, 4096 }
   0x3   :  { %s26_s13 = sshll.u32 %s481_s12, 4  ;;  %p388_p0 = scmp.ne.s32.totalorder %s559_s1, %s387_s16  ;;  %s27_s13 = int_to_ptr.vmem [resolvable:$true] %s26_s13 }
   0x4   :  { %p391_p1 = scmp.lt.u32.totalorder %s387_s16, %s559_s1 }
   0x6   :  { %p393_p2 = pnand %p391_p1, %p388_p0 }
   0x8   :  { %396 = shalt.err (!%p393_p2)
}
   0x9   :  { %s397_s21 = scalar_lea.vmem %s27_s13, 4096  ;;  %p402_p4 = scmp.lt.s32.totalorder %s27_s13, %s27_s13 }
   0xa   :  { %p398_p3 = scmp.ne.s32.totalorder %s27_s13, %s397_s21  ;;  %p403_p5 = scmp.lt.s32.totalorder %s397_s21, %s397_s21 }
   0xc   :  { %p404_p6 = por %p403_p5, %p402_p4 }
   0xe   :  { %p405_p7 = pnand %p404_p6, %p398_p3 }
  0x10   :  { %408 = shalt.err (!%p405_p7)
}
  0x11   :  { %s482_s22 = smov 256   ;;  %s483_s23 = smov 16  }
  0x12   :  { %32 = dma.hbm_to_vmem [thread:$0]  %s559_s1, 4096, %s27_s13, [#allocation6], %s482_s22, %s482_s22, %s483_s23  }
  0x13   :  { %s484_s26 = smov [#allocation2]   ;;  %s485_s28 = smov [#allocation7]  }
  0x14   :  { %s17_s27 = sshll.u32 %s484_s26, 4  ;;  %s38_s29 = sshll.u32 %s485_s28, 4  ;;  %s18_s27 = int_to_ptr.vmem [resolvable:$true] %s17_s27  ;;  %s39_s29 = int_to_ptr.vmem [resolvable:$true] %s38_s29 }
  0x15   :  { %s409_s5 = scalar_lea.hbm %s558_s0, 128 }
  0x16   :  { %p410_p8 = scmp.ne.s32.totalorder %s558_s0, %s409_s5  ;;  %p413_p9 = scmp.lt.u32.totalorder %s409_s5, %s558_s0 }
  0x18   :  { %p415_p10 = pnand %p413_p9, %p410_p8 }
  0x1a   :  { %418 = shalt.err (!%p415_p10)
}
  0x1b   :  { %s419_s1 = scalar_lea.vmem %s18_s27, 128  ;;  %p424_p12 = scmp.lt.s32.totalorder %s18_s27, %s18_s27 }
  0x1c   :  { %p420_p11 = scmp.ne.s32.totalorder %s18_s27, %s419_s1  ;;  %p425_p13 = scmp.lt.s32.totalorder %s419_s1, %s419_s1 }
  0x1e   :  { %p426_p0 = por %p425_p13, %p424_p12 }
  0x20   :  { %p427_p1 = pnand %p426_p0, %p420_p11 }
  0x22   :  { %430 = shalt.err (!%p427_p1)
}
  0x23   :  { %20 = dma.hbm_to_vmem [thread:$0]  %s558_s0, 128, %s18_s27, [#allocation3]  }
  0x24   :  { %s431_s14 = scalar_lea.hbm %s560_s2, 4096 }
  0x25   :  { %p432_p2 = scmp.ne.s32.totalorder %s560_s2, %s431_s14  ;;  %p435_p3 = scmp.lt.u32.totalorder %s431_s14, %s560_s2 }
  0x27   :  { %p437_p4 = pnand %p435_p3, %p432_p2 }
  0x29   :  { %440 = shalt.err (!%p437_p4)
}
  0x2a   :  { %s441_s19 = scalar_lea.vmem %s39_s29, 4096  ;;  %p446_p6 = scmp.lt.s32.totalorder %s39_s29, %s39_s29 }
  0x2b   :  { %p442_p5 = scmp.ne.s32.totalorder %s39_s29, %s441_s19  ;;  %p447_p7 = scmp.lt.s32.totalorder %s441_s19, %s441_s19 }
  0x2d   :  { %p448_p8 = por %p447_p7, %p446_p6 }
  0x2f   :  { %p449_p9 = pnand %p448_p8, %p442_p5 }
  0x31   :  { %452 = shalt.err (!%p449_p9)
}
  0x32   :  { %s486_s0 = smov 128   ;;  %s487_s20 = smov 8  }
  0x33   :  { %44 = dma.hbm_to_vmem [thread:$0]  %s560_s2, 4096, %s39_s29, [#allocation6], %s486_s0, %s486_s0, %s487_s20  }
  0x34   :  { %475 = dma.done.wait [#allocation3], 128  }
  0x35   :  { %476 = vsyncadd [#allocation3], 4294967168 }
  0x36   :  { %477 = dma.done.wait [#allocation6], 8192  }
  0x37   :  { %478 = vsyncadd [#allocation6], 4294959104  ;;  %v488_v0 = vmov 0.0   ;;  %v56_v1 = vld [vmem:[#allocation5 + $0x8] sm:$0xff]  ;;  %v58_v2 = vld [vmem:[#allocation5 + $0x18] sm:$0xff]  ;;  %s489_s2 = smov [#allocation8]  }
  0x38   :  { %151 = vmatprep.mubr.f32.mxu0 %v488_v0  ;;  %v55_v3 = vld [vmem:[#allocation5] sm:$0xff]  ;;  %v314_v4 = vpack.c.bf16 %v58_v2, %v56_v1  ;;  %v57_v5 = vld [vmem:[#allocation5 + $0x10] sm:$0xff]  ;;  %v60_v6 = vld [vmem:[#allocation5 + $0x28] sm:$0xff]  ;;  %s269_s23 = sshll.u32 %s489_s2, 4  ;;  %s270_s23 = int_to_ptr.vmem [resolvable:$true] %s269_s23 }
  0x39   :  { %v62_v7 = vld [vmem:[#allocation5 + $0x38] sm:$0xff]  ;;  %v316_v8 = vpack.c.bf16 %v57_v5, %v55_v3  ;;  %v59_v10 = vld [vmem:[#allocation5 + $0x20] sm:$0xff]  ;;  %v61_v11 = vld [vmem:[#allocation5 + $0x30] sm:$0xff]  ;;  %s453_s24 = scalar_lea.vmem %s270_s23, 128  ;;  %p458_p11 = scmp.lt.s32.totalorder %s270_s23, %s270_s23 }
  0x3a   :  { %v318_v9 = vpack.c.bf16 %v62_v7, %v60_v6  ;;  %v64_v12 = vld [vmem:[#allocation5 + $0x48] sm:$0xff]  ;;  %315 = vmatprep.subr.bf16.mxu0 %v314_v4  ;;  %v66_v13 = vld [vmem:[#allocation5 + $0x58] sm:$0xff]  ;;  %v320_v14 = vpack.c.bf16 %v61_v11, %v59_v10  ;;  %v63_v16 = vld [vmem:[#allocation5 + $0x40] sm:$0xff]  ;;  %p454_p10 = scmp.ne.s32.totalorder %s270_s23, %s453_s24  ;;  %p459_p12 = scmp.lt.s32.totalorder %s453_s24, %s453_s24 }
  0x3b   :  { %317 = vmatpush1.bf16.msra.mxu0 %v316_v8  ;;  %v322_v15 = vpack.c.bf16 %v66_v13, %v64_v12  ;;  %v65_v17 = vld [vmem:[#allocation5 + $0x50] sm:$0xff]  ;;  %v68_v18 = vld [vmem:[#allocation5 + $0x68] sm:$0xff]  ;;  %v70_v19 = vld [vmem:[#allocation5 + $0x78] sm:$0xff] }
  0x3c   :  { %319 = vmatprep.subr.bf16.mxu0 %v318_v9  ;;  %v324_v20 = vpack.c.bf16 %v65_v17, %v63_v16  ;;  %v326_v21 = vpack.c.bf16 %v70_v19, %v68_v18  ;;  %v67_v22 = vld [vmem:[#allocation5 + $0x60] sm:$0xff]  ;;  %v69_v23 = vld [vmem:[#allocation5 + $0x70] sm:$0xff]  ;;  %v72_v24 = vld [vmem:[#allocation5 + $0x88] sm:$0xff]  ;;  %p460_p13 = por %p459_p12, %p458_p11 }
  0x3d   :  { %v74_v25 = vld [vmem:[#allocation5 + $0x98] sm:$0xff]  ;;  %v71_v26 = vld [vmem:[#allocation5 + $0x80] sm:$0xff]  ;;  %v73_v27 = vld [vmem:[#allocation5 + $0x90] sm:$0xff]  ;;  %v328_v31 = vpack.c.bf16 %v69_v23, %v67_v22 }
  0x3e   :  { %v176_v28 = vld [vmem:[#allocation7 + $0x80] sm:$0xff]  ;;  %v177_v29 = vld [vmem:[#allocation7 + $0x88] sm:$0xff]  ;;  %v178_v34 = vld [vmem:[#allocation7 + $0x90] sm:$0xff]  ;;  %v330_v36 = vpack.c.bf16 %v74_v25, %v72_v24  ;;  %v332_v46 = vpack.c.bf16 %v73_v27, %v71_v26  ;;  %p461_p0 = pnand %p460_p13, %p454_p10 }
  0x3f   :  { %321 = vmatpush1.bf16.msra.mxu0 %v320_v14  ;;  %v160_v30 = vld [vmem:[#allocation7] sm:$0xff]  ;;  %v346_v32 = vpack.c.bf16 %v177_v29, %v176_v28  ;;  %v161_v33 = vld [vmem:[#allocation7 + $0x8] sm:$0xff]  ;;  %v179_v35 = vld [vmem:[#allocation7 + $0x98] sm:$0xff] }
  0x40   :  { %323 = vmatprep.subr.bf16.mxu0 %v322_v15  ;;  %v348_v37 = vpack.c.bf16 %v161_v33, %v160_v30  ;;  %v350_v38 = vpack.c.bf16 %v179_v35, %v178_v34  ;;  %v162_v39 = vld [vmem:[#allocation7 + $0x10] sm:$0xff]  ;;  %v163_v40 = vld [vmem:[#allocation7 + $0x18] sm:$0xff]  ;;  %v180_v41 = vld [vmem:[#allocation7 + $0xa0] sm:$0xff] }
  0x41   :  { %v76_v42 = vld [vmem:[#allocation5 + $0xa8] sm:$0xff]  ;;  %v78_v43 = vld [vmem:[#allocation5 + $0xb8] sm:$0xff]  ;;  %347 = vmatprep.subr.bf16.mxu1 %v346_v32  ;;  %v352_v45 = vpack.c.bf16 %v163_v40, %v162_v39  ;;  %v75_v47 = vld [vmem:[#allocation5 + $0xa0] sm:$0xff] }
  0x42   :  { %v181_v44 = vld [vmem:[#allocation7 + $0xa8] sm:$0xff]  ;;  %349 = vmatpush3.bf16.msra.mxu1 %v348_v37  ;;  %v164_v49 = vld [vmem:[#allocation7 + $0x20] sm:$0xff]  ;;  %v334_v51 = vpack.c.bf16 %v78_v43, %v76_v42  ;;  %v77_v52 = vld [vmem:[#allocation5 + $0xb0] sm:$0xff] }
  0x43   :  { %325 = vmatpush1.bf16.msra.mxu0 %v324_v20  ;;  %351 = vmatprep.subr.bf16.mxu1 %v350_v38  ;;  %v354_v48 = vpack.c.bf16 %v181_v44, %v180_v41  ;;  %v165_v50 = vld [vmem:[#allocation7 + $0x28] sm:$0xff]  ;;  %v182_v53 = vld [vmem:[#allocation7 + $0xb0] sm:$0xff]  ;;  %v183_v54 = vld [vmem:[#allocation7 + $0xb8] sm:$0xff]  ;;  %v336_v58 = vpack.c.bf16 %v77_v52, %v75_v47 }
  0x44   :  { %327 = vmatprep.subr.bf16.mxu0 %v326_v21  ;;  %v80_v55 = vld [vmem:[#allocation5 + $0xc8] sm:$0xff]  ;;  %v82_v56 = vld [vmem:[#allocation5 + $0xd8] sm:$0xff]  ;;  %v356_v57 = vpack.c.bf16 %v165_v50, %v164_v49  ;;  %v79_v59 = vld [vmem:[#allocation5 + $0xc0] sm:$0xff]  ;;  %v358_v60 = vpack.c.bf16 %v183_v54, %v182_v53 }
  0x45   :  { %v166_v61 = vld [vmem:[#allocation7 + $0x30] sm:$0xff]  ;;  %v167_v62 = vld [vmem:[#allocation7 + $0x38] sm:$0xff]  ;;  %v338_v63 = vpack.c.bf16 %v82_v56, %v80_v55  ;;  %v184_v1 = vld [vmem:[#allocation7 + $0xc0] sm:$0xff] }
  0x46   :  { %353 = vmatpush3.bf16.msra.mxu1 %v352_v45  ;;  %v81_v0 = vld [vmem:[#allocation5 + $0xd0] sm:$0xff]  ;;  %v185_v2 = vld [vmem:[#allocation7 + $0xc8] sm:$0xff]  ;;  %v86_v4 = vld [vmem:[#allocation5 + $0xf8] sm:$0xff]  ;;  %v360_v5 = vpack.c.bf16 %v167_v62, %v166_v61 }
  0x47   :  { %329 = vmatpush1.bf16.msra.mxu0 %v328_v31  ;;  %355 = vmatprep.subr.bf16.mxu1 %v354_v48  ;;  %v84_v3 = vld [vmem:[#allocation5 + $0xe8] sm:$0xff]  ;;  %v340_v6 = vpack.c.bf16 %v81_v0, %v79_v59  ;;  %v83_v7 = vld [vmem:[#allocation5 + $0xe0] sm:$0xff]  ;;  %v362_v8 = vpack.c.bf16 %v185_v2, %v184_v1  ;;  %v85_v12 = vld [vmem:[#allocation5 + $0xf0] sm:$0xff] }
  0x48   :  { %331 = vmatprep.subr.bf16.mxu0 %v330_v36  ;;  %v168_v9 = vld [vmem:[#allocation7 + $0x40] sm:$0xff]  ;;  %v169_v10 = vld [vmem:[#allocation7 + $0x48] sm:$0xff]  ;;  %v342_v11 = vpack.c.bf16 %v86_v4, %v84_v3  ;;  %v186_v13 = vld [vmem:[#allocation7 + $0xd0] sm:$0xff]  ;;  %v344_v16 = vpack.c.bf16 %v85_v12, %v83_v7 }
  0x49   :  { %v187_v14 = vld [vmem:[#allocation7 + $0xd8] sm:$0xff]  ;;  %v364_v15 = vpack.c.bf16 %v169_v10, %v168_v9  ;;  %v170_v18 = vld [vmem:[#allocation7 + $0x50] sm:$0xff]  ;;  %v188_v20 = vld [vmem:[#allocation7 + $0xe0] sm:$0xff] }
  0x4a   :  { %357 = vmatpush3.bf16.msra.mxu1 %v356_v57  ;;  %v366_v17 = vpack.c.bf16 %v187_v14, %v186_v13  ;;  %v171_v19 = vld [vmem:[#allocation7 + $0x58] sm:$0xff]  ;;  %v189_v21 = vld [vmem:[#allocation7 + $0xe8] sm:$0xff]  ;;  %v172_v25 = vld [vmem:[#allocation7 + $0x60] sm:$0xff] }
  0x4b   :  { %333 = vmatpush1.bf16.msra.mxu0 %v332_v46  ;;  %359 = vmatprep.subr.bf16.mxu1 %v358_v60  ;;  %v368_v22 = vpack.c.bf16 %v171_v19, %v170_v18  ;;  %v54_v23 = vld [vmem:[#allocation2] sm:$0xff]  ;;  %v370_v24 = vpack.c.bf16 %v189_v21, %v188_v20  ;;  %v173_v26 = vld [vmem:[#allocation7 + $0x68] sm:$0xff]  ;;  %v190_v28 = vld [vmem:[#allocation7 + $0xf0] sm:$0xff] }
  0x4c   :  { %335 = vmatprep.subr.bf16.mxu0 %v334_v51  ;;  %v372_v27 = vpack.c.bf16 %v173_v26, %v172_v25  ;;  %v191_v29 = vld [vmem:[#allocation7 + $0xf8] sm:$0xff]  ;;  %v174_v31 = vld [vmem:[#allocation7 + $0x70] sm:$0xff] }
  0x4d   :  { %v374_v30 = vpack.c.bf16 %v191_v29, %v190_v28  ;;  %v175_v32 = vld [vmem:[#allocation7 + $0x78] sm:$0xff] }
  0x4e   :  { %361 = vmatpush3.bf16.msra.mxu1 %v360_v5  ;;  %v376_v33 = vpack.c.bf16 %v175_v32, %v174_v31 }
  0x4f   :  { %337 = vmatpush1.bf16.msra.mxu0 %v336_v58  ;;  %363 = vmatprep.subr.bf16.mxu1 %v362_v8 }
  0x50   :  { %339 = vmatprep.subr.bf16.mxu0 %v338_v63 }
  0x52   :  { %365 = vmatpush3.bf16.msra.mxu1 %v364_v15 }
  0x53   :  { %341 = vmatpush1.bf16.msra.mxu0 %v340_v6  ;;  %367 = vmatprep.subr.bf16.mxu1 %v366_v17 }
  0x54   :  { %343 = vmatprep.subr.bf16.mxu0 %v342_v11 }
  0x56   :  { %369 = vmatpush3.bf16.msra.mxu1 %v368_v22 }
  0x57   :  { %345 = vmatpush1.bf16.msra.mxu0 %v344_v16  ;;  %371 = vmatprep.subr.bf16.mxu1 %v370_v24 }
  0x5a   :  { %152 = vmatmul.mubr.f32.vlgmr.msra.gmra.mrb[0].mxu0 %v54_v23  ;;  %373 = vmatpush3.bf16.msra.mxu1 %v372_v27 }
  0x5b   :  { %375 = vmatprep.subr.bf16.mxu1 %v374_v30 }
  0x5e   :  { %377 = vmatpush3.bf16.msra.mxu1 %v376_v33 }
 0x12d   :  { %v153_v34 = vpop.f32.mrb[0].mxu0 }
 0x12e   :  { %v155_v35 = vpop.f32.mrb[1].mxu0  ;;  %v158_v37 = vmax.f32 %v153_v34, 0.0 }
 0x12f   :  { %v159_v36 = vmax.f32 %v155_v35, 0.0 }
 0x131   :  { %256 = vmatprep.mubr.f32.mxu1 %v159_v36 }
 0x132   :  { %257 = vmatmul.mubr.f32.vlgmr.msra.gmra.mrb[0].mxu1 %v158_v37 }
 0x205   :  { %v311_v38 = vpop.f32.mrb[0].mxu1 }
 0x206   :  { %v312_v39 = vpop.f32.mrb[1].mxu1 }
 0x207   :  { %v313_v40 = vadd.f32 %v312_v39, %v311_v38 }
 0x209   :  { %262 = vst [vmem:[#allocation8] sm:$0xff] %v313_v40 }
 0x20a   :  { %464 = shalt.err (!%p461_p0)
}
 0x20b   :  { %s465_s27 = scalar_lea.hbm %s561_s3, 128 }
 0x20c   :  { %p466_p1 = scmp.ne.s32.totalorder %s561_s3, %s465_s27  ;;  %p469_p2 = scmp.lt.u32.totalorder %s465_s27, %s561_s3 }
 0x20e   :  { %p471_p3 = pnand %p469_p2, %p466_p1 }
 0x210   :  { %474 = shalt.err (!%p471_p3)
}
 0x211   :  { %272 = dma.vmem_to_hbm [thread:$0]  %s270_s23, 128, %s561_s3, [#allocation4]  }
 0x212   :  { %479 = dma.done.wait [#allocation4], 128  }
 0x213   :  { %480 = vsyncadd [#allocation4], 4294967168 }
 0x214   :  { %276 = vsyncpa [#allocation3], 1 }
 0x215   :  { %277 = vsyncpa [#allocation6], 1 }
 0x216   :  { %278 = vsyncpa [#allocation4], 1 }

// kernel: tpu_custom_call.1
= control target key start
LH: loop header
LB: loop body
LE: loop exit
PB: predicated region body
PF: predicated region fallthrough
CT: control target
= control target key end

     0   :  { %8 = vsyncpa [#allocation3], 0  ;;  %s558_s0 = inlined_call_operand.hbm [shape: f32[8,128], index: 0, kind: input, shape index: {}]   ;;  %s559_s1 = inlined_call_operand.hbm [shape: f32[128,256], index: 1, kind: input, shape index: {}]   ;;  %s560_s2 = inlined_call_operand.hbm [shape: f32[256,128], index: 2, kind: input, shape index: {}]   ;;  %s561_s3 = inlined_call_operand.hbm [shape: f32[8,128], index: 3, kind: output, shape index: {}]  }
   0x1   :  { %9 = vsyncpa [#allocation6], 0 }
   0x2   :  { %10 = vsyncpa [#allocation4], 0  ;;  %s481_s12 = smov [#allocation5]   ;;  %s387_s16 = scalar_lea.hbm %s559_s1, 4096 }
   0x3   :  { %s26_s13 = sshll.u32 %s481_s12, 4  ;;  %p388_p0 = scmp.ne.s32.totalorder %s559_s1, %s387_s16  ;;  %s27_s13 = int_to_ptr.vmem [resolvable:$true] %s26_s13 }
   0x4   :  { %p391_p1 = scmp.lt.u32.totalorder %s387_s16, %s559_s1 }
   0x6   :  { %p393_p2 = pnand %p391_p1, %p388_p0 }
   0x8   :  { %396 = shalt.err (!%p393_p2)
}
   0x9   :  { %s397_s21 = scalar_lea.vmem %s27_s13, 4096  ;;  %p402_p4 = scmp.lt.s32.totalorder %s27_s13, %s27_s13 }
   0xa   :  { %p398_p3 = scmp.ne.s32.totalorder %s27_s13, %s397_s21  ;;  %p403_p5 = scmp.lt.s32.totalorder %s397_s21, %s397_s21 }
   0xc   :  { %p404_p6 = por %p403_p5, %p402_p4 }
   0xe   :  { %p405_p7 = pnand %p404_p6, %p398_p3 }
  0x10   :  { %408 = shalt.err (!%p405_p7)
}
  0x11   :  { %s482_s22 = smov 256   ;;  %s483_s23 = smov 16  }
  0x12   :  { %32 = dma.hbm_to_vmem [thread:$0]  %s559_s1, 4096, %s27_s13, [#allocation6], %s482_s22, %s482_s22, %s483_s23  }
  0x13   :  { %s484_s26 = smov [#allocation2]   ;;  %s485_s28 = smov [#allocation7]  }
  0x14   :  { %s17_s27 = sshll.u32 %s484_s26, 4  ;;  %s38_s29 = sshll.u32 %s485_s28, 4  ;;  %s18_s27 = int_to_ptr.vmem [resolvable:$true] %s17_s27  ;;  %s39_s29 = int_to_ptr.vmem [resolvable:$true] %s38_s29 }
  0x15   :  { %s409_s5 = scalar_lea.hbm %s558_s0, 128 }
  0x16   :  { %p410_p8 = scmp.ne.s32.totalorder %s558_s0, %s409_s5  ;;  %p413_p9 = scmp.lt.u32.totalorder %s409_s5, %s558_s0 }
  0x18   :  { %p415_p10 = pnand %p413_p9, %p410_p8 }
  0x1a   :  { %418 = shalt.err (!%p415_p10)
}
  0x1b   :  { %s419_s1 = scalar_lea.vmem %s18_s27, 128  ;;  %p424_p12 = scmp.lt.s32.totalorder %s18_s27, %s18_s27 }
  0x1c   :  { %p420_p11 = scmp.ne.s32.totalorder %s18_s27, %s419_s1  ;;  %p425_p13 = scmp.lt.s32.totalorder %s419_s1, %s419_s1 }
  0x1e   :  { %p426_p0 = por %p425_p13, %p424_p12 }
  0x20   :  { %p427_p1 = pnand %p426_p0, %p420_p11 }
  0x22   :  { %430 = shalt.err (!%p427_p1)
}
  0x23   :  { %20 = dma.hbm_to_vmem [thread:$0]  %s558_s0, 128, %s18_s27, [#allocation3]  }
  0x24   :  { %s431_s14 = scalar_lea.hbm %s560_s2, 4096 }
  0x25   :  { %p432_p2 = scmp.ne.s32.totalorder %s560_s2, %s431_s14  ;;  %p435_p3 = scmp.lt.u32.totalorder %s431_s14, %s560_s2 }
  0x27   :  { %p437_p4 = pnand %p435_p3, %p432_p2 }
  0x29   :  { %440 = shalt.err (!%p437_p4)
}
  0x2a   :  { %s441_s19 = scalar_lea.vmem %s39_s29, 4096  ;;  %p446_p6 = scmp.lt.s32.totalorder %s39_s29, %s39_s29 }
  0x2b   :  { %p442_p5 = scmp.ne.s32.totalorder %s39_s29, %s441_s19  ;;  %p447_p7 = scmp.lt.s32.totalorder %s441_s19, %s441_s19 }
  0x2d   :  { %p448_p8 = por %p447_p7, %p446_p6 }
  0x2f   :  { %p449_p9 = pnand %p448_p8, %p442_p5 }
  0x31   :  { %452 = shalt.err (!%p449_p9)
}
  0x32   :  { %s486_s0 = smov 128   ;;  %s487_s20 = smov 8  }
  0x33   :  { %44 = dma.hbm_to_vmem [thread:$0]  %s560_s2, 4096, %s39_s29, [#allocation6], %s486_s0, %s486_s0, %s487_s20  }
  0x34   :  { %475 = dma.done.wait [#allocation3], 128  }
  0x35   :  { %476 = vsyncadd [#allocation3], 4294967168 }
  0x36   :  { %477 = dma.done.wait [#allocation6], 8192  }
  0x37   :  { %478 = vsyncadd [#allocation6], 4294959104  ;;  %v488_v0 = vmov 0.0   ;;  %v56_v1 = vld [vmem:[#allocation5 + $0x8] sm:$0xff]  ;;  %v58_v2 = vld [vmem:[#allocation5 + $0x18] sm:$0xff]  ;;  %s489_s2 = smov [#allocation8]  }
  0x38   :  { %151 = vmatprep.mubr.f32.mxu0 %v488_v0  ;;  %v55_v3 = vld [vmem:[#allocation5] sm:$0xff]  ;;  %v314_v4 = vpack.c.bf16 %v58_v2, %v56_v1  ;;  %v57_v5 = vld [vmem:[#allocation5 + $0x10] sm:$0xff]  ;;  %v60_v6 = vld [vmem:[#allocation5 + $0x28] sm:$0xff]  ;;  %s269_s23 = sshll.u32 %s489_s2, 4  ;;  %s270_s23 = int_to_ptr.vmem [resolvable:$true] %s269_s23 }
  0x39   :  { %v62_v7 = vld [vmem:[#allocation5 + $0x38] sm:$0xff]  ;;  %v316_v8 = vpack.c.bf16 %v57_v5, %v55_v3  ;;  %v59_v10 = vld [vmem:[#allocation5 + $0x20] sm:$0xff]  ;;  %v61_v11 = vld [vmem:[#allocation5 + $0x30] sm:$0xff]  ;;  %s453_s24 = scalar_lea.vmem %s270_s23, 128  ;;  %p458_p11 = scmp.lt.s32.totalorder %s270_s23, %s270_s23 }
  0x3a   :  { %v318_v9 = vpack.c.bf16 %v62_v7, %v60_v6  ;;  %v64_v12 = vld [vmem:[#allocation5 + $0x48] sm:$0xff]  ;;  %315 = vmatprep.subr.bf16.mxu0 %v314_v4  ;;  %v66_v13 = vld [vmem:[#allocation5 + $0x58] sm:$0xff]  ;;  %v320_v14 = vpack.c.bf16 %v61_v11, %v59_v10  ;;  %v63_v16 = vld [vmem:[#allocation5 + $0x40] sm:$0xff]  ;;  %p454_p10 = scmp.ne.s32.totalorder %s270_s23, %s453_s24  ;;  %p459_p12 = scmp.lt.s32.totalorder %s453_s24, %s453_s24 }
  0x3b   :  { %317 = vmatpush1.bf16.msra.mxu0 %v316_v8  ;;  %v322_v15 = vpack.c.bf16 %v66_v13, %v64_v12  ;;  %v65_v17 = vld [vmem:[#allocation5 + $0x50] sm:$0xff]  ;;  %v68_v18 = vld [vmem:[#allocation5 + $0x68] sm:$0xff]  ;;  %v70_v19 = vld [vmem:[#allocation5 + $0x78] sm:$0xff] }
  0x3c   :  { %319 = vmatprep.subr.bf16.mxu0 %v318_v9  ;;  %v324_v20 = vpack.c.bf16 %v65_v17, %v63_v16  ;;  %v326_v21 = vpack.c.bf16 %v70_v19, %v68_v18  ;;  %v67_v22 = vld [vmem:[#allocation5 + $0x60] sm:$0xff]  ;;  %v69_v23 = vld [vmem:[#allocation5 + $0x70] sm:$0xff]  ;;  %v72_v24 = vld [vmem:[#allocation5 + $0x88] sm:$0xff]  ;;  %p460_p13 = por %p459_p12, %p458_p11 }
  0x3d   :  { %v74_v25 = vld [vmem:[#allocation5 + $0x98] sm:$0xff]  ;;  %v71_v26 = vld [vmem:[#allocation5 + $0x80] sm:$0xff]  ;;  %v73_v27 = vld [vmem:[#allocation5 + $0x90] sm:$0xff]  ;;  %v328_v31 = vpack.c.bf16 %v69_v23, %v67_v22 }
  0x3e   :  { %v176_v28 = vld [vmem:[#allocation7 + $0x80] sm:$0xff]  ;;  %v177_v29 = vld [vmem:[#allocation7 + $0x88] sm:$0xff]  ;;  %v178_v34 = vld [vmem:[#allocation7 + $0x90] sm:$0xff]  ;;  %v330_v36 = vpack.c.bf16 %v74_v25, %v72_v24  ;;  %v332_v46 = vpack.c.bf16 %v73_v27, %v71_v26  ;;  %p461_p0 = pnand %p460_p13, %p454_p10 }
  0x3f   :  { %321 = vmatpush1.bf16.msra.mxu0 %v320_v14  ;;  %v160_v30 = vld [vmem:[#allocation7] sm:$0xff]  ;;  %v346_v32 = vpack.c.bf16 %v177_v29, %v176_v28  ;;  %v161_v33 = vld [vmem:[#allocation7 + $0x8] sm:$0xff]  ;;  %v179_v35 = vld [vmem:[#allocation7 + $0x98] sm:$0xff] }
  0x40   :  { %323 = vmatprep.subr.bf16.mxu0 %v322_v15  ;;  %v348_v37 = vpack.c.bf16 %v161_v33, %v160_v30  ;;  %v350_v38 = vpack.c.bf16 %v179_v35, %v178_v34  ;;  %v162_v39 = vld [vmem:[#allocation7 + $0x10] sm:$0xff]  ;;  %v163_v40 = vld [vmem:[#allocation7 + $0x18] sm:$0xff]  ;;  %v180_v41 = vld [vmem:[#allocation7 + $0xa0] sm:$0xff] }
  0x41   :  { %v76_v42 = vld [vmem:[#allocation5 + $0xa8] sm:$0xff]  ;;  %v78_v43 = vld [vmem:[#allocation5 + $0xb8] sm:$0xff]  ;;  %347 = vmatprep.subr.bf16.mxu1 %v346_v32  ;;  %v352_v45 = vpack.c.bf16 %v163_v40, %v162_v39  ;;  %v75_v47 = vld [vmem:[#allocation5 + $0xa0] sm:$0xff] }
  0x42   :  { %v181_v44 = vld [vmem:[#allocation7 + $0xa8] sm:$0xff]  ;;  %349 = vmatpush3.bf16.msra.mxu1 %v348_v37  ;;  %v164_v49 = vld [vmem:[#allocation7 + $0x20] sm:$0xff]  ;;  %v334_v51 = vpack.c.bf16 %v78_v43, %v76_v42  ;;  %v77_v52 = vld [vmem:[#allocation5 + $0xb0] sm:$0xff] }
  0x43   :  { %325 = vmatpush1.bf16.msra.mxu0 %v324_v20  ;;  %351 = vmatprep.subr.bf16.mxu1 %v350_v38  ;;  %v354_v48 = vpack.c.bf16 %v181_v44, %v180_v41  ;;  %v165_v50 = vld [vmem:[#allocation7 + $0x28] sm:$0xff]  ;;  %v182_v53 = vld [vmem:[#allocation7 + $0xb0] sm:$0xff]  ;;  %v183_v54 = vld [vmem:[#allocation7 + $0xb8] sm:$0xff]  ;;  %v336_v58 = vpack.c.bf16 %v77_v52, %v75_v47 }
  0x44   :  { %327 = vmatprep.subr.bf16.mxu0 %v326_v21  ;;  %v80_v55 = vld [vmem:[#allocation5 + $0xc8] sm:$0xff]  ;;  %v82_v56 = vld [vmem:[#allocation5 + $0xd8] sm:$0xff]  ;;  %v356_v57 = vpack.c.bf16 %v165_v50, %v164_v49  ;;  %v79_v59 = vld [vmem:[#allocation5 + $0xc0] sm:$0xff]  ;;  %v358_v60 = vpack.c.bf16 %v183_v54, %v182_v53 }
  0x45   :  { %v166_v61 = vld [vmem:[#allocation7 + $0x30] sm:$0xff]  ;;  %v167_v62 = vld [vmem:[#allocation7 + $0x38] sm:$0xff]  ;;  %v338_v63 = vpack.c.bf16 %v82_v56, %v80_v55  ;;  %v184_v1 = vld [vmem:[#allocation7 + $0xc0] sm:$0xff] }
  0x46   :  { %353 = vmatpush3.bf16.msra.mxu1 %v352_v45  ;;  %v81_v0 = vld [vmem:[#allocation5 + $0xd0] sm:$0xff]  ;;  %v185_v2 = vld [vmem:[#allocation7 + $0xc8] sm:$0xff]  ;;  %v86_v4 = vld [vmem:[#allocation5 + $0xf8] sm:$0xff]  ;;  %v360_v5 = vpack.c.bf16 %v167_v62, %v166_v61 }
  0x47   :  { %329 = vmatpush1.bf16.msra.mxu0 %v328_v31  ;;  %355 = vmatprep.subr.bf16.mxu1 %v354_v48  ;;  %v84_v3 = vld [vmem:[#allocation5 + $0xe8] sm:$0xff]  ;;  %v340_v6 = vpack.c.bf16 %v81_v0, %v79_v59  ;;  %v83_v7 = vld [vmem:[#allocation5 + $0xe0] sm:$0xff]  ;;  %v362_v8 = vpack.c.bf16 %v185_v2, %v184_v1  ;;  %v85_v12 = vld [vmem:[#allocation5 + $0xf0] sm:$0xff] }
  0x48   :  { %331 = vmatprep.subr.bf16.mxu0 %v330_v36  ;;  %v168_v9 = vld [vmem:[#allocation7 + $0x40] sm:$0xff]  ;;  %v169_v10 = vld [vmem:[#allocation7 + $0x48] sm:$0xff]  ;;  %v342_v11 = vpack.c.bf16 %v86_v4, %v84_v3  ;;  %v186_v13 = vld [vmem:[#allocation7 + $0xd0] sm:$0xff]  ;;  %v344_v16 = vpack.c.bf16 %v85_v12, %v83_v7 }
  0x49   :  { %v187_v14 = vld [vmem:[#allocation7 + $0xd8] sm:$0xff]  ;;  %v364_v15 = vpack.c.bf16 %v169_v10, %v168_v9  ;;  %v170_v18 = vld [vmem:[#allocation7 + $0x50] sm:$0xff]  ;;  %v188_v20 = vld [vmem:[#allocation7 + $0xe0] sm:$0xff] }
  0x4a   :  { %357 = vmatpush3.bf16.msra.mxu1 %v356_v57  ;;  %v366_v17 = vpack.c.bf16 %v187_v14, %v186_v13  ;;  %v171_v19 = vld [vmem:[#allocation7 + $0x58] sm:$0xff]  ;;  %v189_v21 = vld [vmem:[#allocation7 + $0xe8] sm:$0xff]  ;;  %v172_v25 = vld [vmem:[#allocation7 + $0x60] sm:$0xff] }
  0x4b   :  { %333 = vmatpush1.bf16.msra.mxu0 %v332_v46  ;;  %359 = vmatprep.subr.bf16.mxu1 %v358_v60  ;;  %v368_v22 = vpack.c.bf16 %v171_v19, %v170_v18  ;;  %v54_v23 = vld [vmem:[#allocation2] sm:$0xff]  ;;  %v370_v24 = vpack.c.bf16 %v189_v21, %v188_v20  ;;  %v173_v26 = vld [vmem:[#allocation7 + $0x68] sm:$0xff]  ;;  %v190_v28 = vld [vmem:[#allocation7 + $0xf0] sm:$0xff] }
  0x4c   :  { %335 = vmatprep.subr.bf16.mxu0 %v334_v51  ;;  %v372_v27 = vpack.c.bf16 %v173_v26, %v172_v25  ;;  %v191_v29 = vld [vmem:[#allocation7 + $0xf8] sm:$0xff]  ;;  %v174_v31 = vld [vmem:[#allocation7 + $0x70] sm:$0xff] }
  0x4d   :  { %v374_v30 = vpack.c.bf16 %v191_v29, %v190_v28  ;;  %v175_v32 = vld [vmem:[#allocation7 + $0x78] sm:$0xff] }
  0x4e   :  { %361 = vmatpush3.bf16.msra.mxu1 %v360_v5  ;;  %v376_v33 = vpack.c.bf16 %v175_v32, %v174_v31 }
  0x4f   :  { %337 = vmatpush1.bf16.msra.mxu0 %v336_v58  ;;  %363 = vmatprep.subr.bf16.mxu1 %v362_v8 }
  0x50   :  { %339 = vmatprep.subr.bf16.mxu0 %v338_v63 }
  0x52   :  { %365 = vmatpush3.bf16.msra.mxu1 %v364_v15 }
  0x53   :  { %341 = vmatpush1.bf16.msra.mxu0 %v340_v6  ;;  %367 = vmatprep.subr.bf16.mxu1 %v366_v17 }
  0x54   :  { %343 = vmatprep.subr.bf16.mxu0 %v342_v11 }
  0x56   :  { %369 = vmatpush3.bf16.msra.mxu1 %v368_v22 }
  0x57   :  { %345 = vmatpush1.bf16.msra.mxu0 %v344_v16  ;;  %371 = vmatprep.subr.bf16.mxu1 %v370_v24 }
  0x5a   :  { %152 = vmatmul.mubr.f32.vlgmr.msra.gmra.mrb[0].mxu0 %v54_v23  ;;  %373 = vmatpush3.bf16.msra.mxu1 %v372_v27 }
  0x5b   :  { %375 = vmatprep.subr.bf16.mxu1 %v374_v30 }
  0x5e   :  { %377 = vmatpush3.bf16.msra.mxu1 %v376_v33 }
 0x12d   :  { %v153_v34 = vpop.f32.mrb[0].mxu0 }
 0x12e   :  { %v155_v35 = vpop.f32.mrb[1].mxu0  ;;  %v158_v37 = vmax.f32 %v153_v34, 0.0 }
 0x12f   :  { %v159_v36 = vmax.f32 %v155_v35, 0.0 }
 0x131   :  { %256 = vmatprep.mubr.f32.mxu1 %v159_v36 }
 0x132   :  { %257 = vmatmul.mubr.f32.vlgmr.msra.gmra.mrb[0].mxu1 %v158_v37 }
 0x205   :  { %v311_v38 = vpop.f32.mrb[0].mxu1 }
 0x206   :  { %v312_v39 = vpop.f32.mrb[1].mxu1 }
 0x207   :  { %v313_v40 = vadd.f32 %v312_v39, %v311_v38 }
 0x209   :  { %262 = vst [vmem:[#allocation8] sm:$0xff] %v313_v40 }
 0x20a   :  { %464 = shalt.err (!%p461_p0)
}
 0x20b   :  { %s465_s27 = scalar_lea.hbm %s561_s3, 128 }
 0x20c   :  { %p466_p1 = scmp.ne.s32.totalorder %s561_s3, %s465_s27  ;;  %p469_p2 = scmp.lt.u32.totalorder %s465_s27, %s561_s3 }
 0x20e   :  { %p471_p3 = pnand %p469_p2, %p466_p1 }
 0x210   :  { %474 = shalt.err (!%p471_p3)
}
 0x211   :  { %272 = dma.vmem_to_hbm [thread:$0]  %s270_s23, 128, %s561_s3, [#allocation4]  }
 0x212   :  { %479 = dma.done.wait [#allocation4], 128  }
 0x213   :  { %480 = vsyncadd [#allocation4], 4294967168 }
 0x214   :  { %276 = vsyncpa [#allocation3], 1 }
 0x215   :  { %277 = vsyncpa [#allocation6], 1 }
 0x216   :  { %278 = vsyncpa [#allocation4], 1 }

</bundles_post_ra>
